<compile_context>
chip_gen: v7x
topology: tpu7x:2x2x1
jax: 0.10.0
libtpu: 0.0.40
codegen_flags: <defaults>
</compile_context>

<pallas_src>
import jax
import jax.numpy as jnp
from jax.experimental import pallas as pl
from jax.experimental.pallas import tpu as pltpu

BN_EPS = 1e-5
_LANE = 128
_VMEM_LIMIT = 32 * 1024 * 1024         # safe scoped VMEM limit on v5e / v6e / v7x
_STEP_BYTES_TARGET = 8 * 1024 * 1024   # double-buffered (Cin+Cout) block bytes per step
_TILE_CAP = 32768                      # bounds unroll length / intermediate size
_CACHE_BYTES_MAX = 12 * 1024 * 1024    # keep x VMEM-resident only below this


def _round_up(v, m):
    return ((v + m - 1) // m) * m


def self_distillation_forward(x_nchw, conv_w, conv_b, bn_gamma, bn_beta):
    """conv1x1 -> BatchNorm2d (training-mode batch stats) -> ReLU, NCHW in/out.

    `conv_b` is accepted for interface parity but never used: the bias is
    mathematically cancelled by the batch-norm mean subtraction.
    """
    n, cin, h, w = x_nchw.shape
    cout = conv_w.shape[0]
    hw = h * w
    x_dtype = x_nchw.dtype
    itemsize = x_nchw.dtype.itemsize

    # Free reshapes (merge / split trailing dims only -> no extra HBM pass).
    x3d = x_nchw.reshape(n, cin, hw)
    w2d = conv_w.reshape(cout, cin).astype(jnp.float32)      # tiny
    gamma = bn_gamma.astype(jnp.float32).reshape(cout, 1)    # tiny
    beta = bn_beta.astype(jnp.float32).reshape(cout, 1)      # tiny

    # ---- spatial tile: lane-dense, sized by bytes ---------------------------
    if hw <= _LANE:
        t = hw                                  # full-extent block is allowed
    else:
        t = (_STEP_BYTES_TARGET // (2 * (cin + cout) * itemsize)) // _LANE * _LANE
        t = max(_LANE, min(t, _TILE_CAP, _round_up(hw, _LANE)))
    t = int(t)
    n_tiles = -(-hw // t)
    ragged = (hw % t) != 0
    acc_w = _LANE if (t % _LANE == 0) else t    # lane width of the stat partials
    inv_m = 1.0 / float(n * hw)                 # true element count per channel

    # Keep x resident in VMEM across both phases if it fits the budget
    # (budget chosen against v7x's 64 MiB physical VMEM; v5e/v6e have 128 MiB).
    cache_slots = n * n_tiles
    cache_bytes = cache_slots * _round_up(cin, 8) * _round_up(t, _LANE) * itemsize
    use_cache = cache_bytes <= _CACHE_BYTES_MAX

    def kernel(x_ref, w_ref, g_ref, b_ref, o_ref,
               sum_acc, sq_acc, ws_ref, shift_ref, *cache):
        xcache = cache[0] if use_cache else None
        p = pl.program_id(0)
        i = pl.program_id(1)
        j = pl.program_id(2)

        @pl.when((p == 0) & (i == 0) & (j == 0))
        def _init():
            sum_acc[...] = jnp.zeros_like(sum_acc)
            sq_acc[...] = jnp.zeros_like(sq_acc)

        @pl.when(p == 0)
        def _stats():
            x_tile = x_ref[...]                                     # (Cin, T)
            if ragged:
                # Boundary blocks are padded with unspecified data: mask them
                # out so they contribute zero to the statistics.
                col = j * t + jax.lax.broadcasted_iota(jnp.int32, (1, t), 1)
                x_tile = jnp.where(col < hw, x_tile, jnp.zeros_like(x_tile))
            if use_cache:
                xcache[i * n_tiles + j] = x_tile
            y = jnp.dot(w_ref[...], x_tile.astype(jnp.float32),
                        preferred_element_type=jnp.float32)         # (Cout, T)
            # Lane-parallel partials (VPU only); XLU reduce deferred to _fold.
            ps = jnp.zeros((cout, acc_w), jnp.float32)
            pq = jnp.zeros((cout, acc_w), jnp.float32)
            for c in range(t // acc_w):
                yc = y[:, c * acc_w:(c + 1) * acc_w]
                ps = ps + yc
                pq = pq + yc * yc
            sum_acc[...] += ps
            sq_acc[...] += pq

        @pl.when((p == 1) & (i == 0) & (j == 0))
        def _fold():
            total_s = jnp.sum(sum_acc[...], axis=1, keepdims=True)  # (Cout, 1)
            total_q = jnp.sum(sq_acc[...], axis=1, keepdims=True)
            mean = total_s * inv_m
            # NOTE: E[y^2]-E[y]^2 in f32, clamped; cancellation risk only if
            # |mean| >> std, acceptable for this module.
            var = jnp.maximum(total_q * inv_m - mean * mean, 0.0)
            scale = g_ref[...] * jax.lax.rsqrt(var + BN_EPS)         # (Cout, 1)
            shift_ref[...] = b_ref[...] - mean * scale
            ws_ref[...] = w_ref[...] * scale                         # fold scale into W

        @pl.when(p == 1)
        def _apply():
            if use_cache:
                x_tile = xcache[i * n_tiles + j]
            else:
                x_tile = x_ref[...]
            y = jnp.dot(ws_ref[...], x_tile.astype(jnp.float32),
                        preferred_element_type=jnp.float32)
            o_ref[...] = jnp.maximum(y + shift_ref[...], 0.0).astype(o_ref.dtype)

    if use_cache:
        # Phase 1 pins the x block to (0,...): no further HBM reads of x.
        x_map = lambda p, i, j: (i * (1 - p), 0, j * (1 - p))
    else:
        x_map = lambda p, i, j: (i, 0, j)
    # Pin the output block during phase 0 (kernel never writes it there) so no
    # garbage write-back happens before phase 1 produces real data.
    o_map = lambda p, i, j: (i * p, 0, j * p)

    scratch = [
        pltpu.VMEM((cout, acc_w), jnp.float32),   # sum partials
        pltpu.VMEM((cout, acc_w), jnp.float32),   # sum-of-squares partials
        pltpu.VMEM((cout, cin), jnp.float32),     # scale-folded weights
        pltpu.VMEM((cout, 1), jnp.float32),       # shift
    ]
    if use_cache:
        scratch.append(pltpu.VMEM((cache_slots, cin, t), x_dtype))

    out3d = pl.pallas_call(
        kernel,
        out_shape=jax.ShapeDtypeStruct((n, cout, hw), x_dtype),
        grid=(2, n, n_tiles),
        in_specs=[
            pl.BlockSpec((pl.Squeezed(), cin, t), x_map),
            pl.BlockSpec((cout, cin), lambda p, i, j: (0, 0)),
            pl.BlockSpec((cout, 1), lambda p, i, j: (0, 0)),
            pl.BlockSpec((cout, 1), lambda p, i, j: (0, 0)),
        ],
        out_specs=pl.BlockSpec((pl.Squeezed(), cout, t), o_map),
        scratch_shapes=scratch,
        compiler_params=pltpu.CompilerParams(
            dimension_semantics=("arbitrary", "arbitrary", "arbitrary"),
            vmem_limit_bytes=_VMEM_LIMIT,
        ),
    )(x3d, w2d, gamma, beta)

    return out3d.reshape(n, cout, h, w)


if __name__ == "__main__":
    # Small shapes consistent with the module: batch=2, in_channels=4,
    # out_channels=8, spatial=16x16.
    N, CIN, COUT, H, W = 2, 4, 8, 16, 16

    key = jax.random.PRNGKey(0)
    kx, kw, kb, kg, kbe = jax.random.split(key, 5)

    x = jax.random.normal(kx, (N, CIN, H, W), dtype=jnp.float32)
    conv_w = jax.random.normal(kw, (COUT, CIN, 1, 1), dtype=jnp.float32) * 0.1
    conv_b = jax.random.normal(kb, (COUT,), dtype=jnp.float32) * 0.1
    bn_gamma = jnp.ones((COUT,), dtype=jnp.float32) + 0.05 * jax.random.normal(
        kg, (COUT,), dtype=jnp.float32
    )
    bn_beta = 0.05 * jax.random.normal(kbe, (COUT,), dtype=jnp.float32)

    out = self_distillation_forward(x, conv_w, conv_b, bn_gamma, bn_beta)
    out = jax.block_until_ready(out)

    # Pure-JAX reference: exact module math (training-mode BN), *including* the
    # conv bias — the kernel drops it because it cancels in BN.
    x2d = jnp.transpose(x, (0, 2, 3, 1)).reshape(-1, CIN)
    y = x2d @ jnp.transpose(conv_w.reshape(COUT, CIN)) + conv_b
    mean = jnp.mean(y, axis=0, keepdims=True)
    var = jnp.mean((y - mean) ** 2, axis=0, keepdims=True)
    ref2d = jnp.maximum((y - mean) / jnp.sqrt(var + BN_EPS) * bn_gamma + bn_beta, 0.0)
    ref = jnp.transpose(ref2d.reshape(N, H, W, COUT), (0, 3, 1, 2))

    assert out.shape == (N, COUT, H, W)
    max_err = float(jnp.max(jnp.abs(out - ref)))
    assert max_err < 1e-4, f"max_err={max_err}"

    print("KERNEL_OK")
</pallas_src>

<mosaic_0001>
module attributes {stable_mosaic.version = 11 : i64} {
  func.func @kernel(%arg0: i32, %arg1: i32, %arg2: i32, %arg3: memref<1x4x256xf32, #tpu.memory_space<vmem>>, %arg4: memref<8x4xf32, #tpu.memory_space<vmem>>, %arg5: memref<8x1xf32, #tpu.memory_space<vmem>>, %arg6: memref<8x1xf32, #tpu.memory_space<vmem>>, %arg7: memref<1x8x256xf32, #tpu.memory_space<vmem>>, %arg8: memref<8x128xf32, #tpu.memory_space<vmem>>, %arg9: memref<8x128xf32, #tpu.memory_space<vmem>>, %arg10: memref<8x4xf32, #tpu.memory_space<vmem>>, %arg11: memref<8x1xf32, #tpu.memory_space<vmem>>, %arg12: memref<2x4x256xf32, #tpu.memory_space<vmem>>) attributes {dimension_semantics = [#tpu.dimension_semantics<arbitrary>, #tpu.dimension_semantics<arbitrary>, #tpu.dimension_semantics<arbitrary>], iteration_bounds = array<i64: 2, 2, 1>, scalar_prefetch = 0 : i64, scratch_operands = 5 : i64, tpu.core_type = #tpu.core_type<tc>, window_params = [{transform_indices = @transform_0, window_bounds = array<i64: 1, 4, 256>}, {pipeline_mode = #tpu.pipeline_mode<synchronous>, transform_indices = @transform_1, window_bounds = array<i64: 8, 4>}, {pipeline_mode = #tpu.pipeline_mode<synchronous>, transform_indices = @transform_2, window_bounds = array<i64: 8, 1>}, {pipeline_mode = #tpu.pipeline_mode<synchronous>, transform_indices = @transform_3, window_bounds = array<i64: 8, 1>}, {transform_indices = @transform_4, window_bounds = array<i64: 1, 8, 256>}]} {
    %c0_i32 = arith.constant 0 : i32
    %0 = arith.cmpi eq, %arg0, %c0_i32 : i32
    %c0_i32_0 = arith.constant 0 : i32
    %1 = arith.cmpi eq, %arg1, %c0_i32_0 : i32
    %2 = arith.andi %0, %1 : i1
    %c0_i32_1 = arith.constant 0 : i32
    %3 = arith.cmpi eq, %arg2, %c0_i32_1 : i32
    %4 = arith.andi %2, %3 : i1
    %5 = arith.extui %4 : i1 to i32
    %c0_i32_2 = arith.constant 0 : i32
    %6 = arith.cmpi ne, %5, %c0_i32_2 : i32
    scf.if %6 {
      %cst = arith.constant 0.000000e+00 : f32
      %20 = vector.broadcast %cst : f32 to vector<8x128xf32>
      %c0 = arith.constant 0 : index
      %c0_10 = arith.constant 0 : index
      %21 = vector.load %arg8[%c0, %c0_10] : memref<8x128xf32, #tpu.memory_space<vmem>>, vector<8x128xf32>
      tpu.vector_store %arg8[%c0, %c0_10], %20 {strides = array<i32>} : memref<8x128xf32, #tpu.memory_space<vmem>>, vector<8x128xf32>,
      %cst_11 = arith.constant 0.000000e+00 : f32
      %22 = vector.broadcast %cst_11 : f32 to vector<8x128xf32>
      %c0_12 = arith.constant 0 : index
      %c0_13 = arith.constant 0 : index
      %23 = vector.load %arg9[%c0_12, %c0_13] : memref<8x128xf32, #tpu.memory_space<vmem>>, vector<8x128xf32>
      tpu.vector_store %arg9[%c0_12, %c0_13], %22 {strides = array<i32>} : memref<8x128xf32, #tpu.memory_space<vmem>>, vector<8x128xf32>,
    } else {
    }
    %c0_i32_3 = arith.constant 0 : i32
    %7 = arith.cmpi eq, %arg0, %c0_i32_3 : i32
    %8 = arith.extui %7 : i1 to i32
    %c0_i32_4 = arith.constant 0 : i32
    %9 = arith.cmpi ne, %8, %c0_i32_4 : i32
    scf.if %9 {
      %c0 = arith.constant 0 : index
      %c0_10 = arith.constant 0 : index
      %c0_11 = arith.constant 0 : index
      %20 = vector.load %arg3[%c0, %c0_10, %c0_11] : memref<1x4x256xf32, #tpu.memory_space<vmem>>, vector<1x4x256xf32>
      %21 = vector.shape_cast %20 : vector<1x4x256xf32> to vector<4x256xf32>
      %c1_i32_12 = arith.constant 1 : i32
      %22 = arith.muli %arg1, %c1_i32_12 : i32
      %23 = arith.addi %22, %arg2 : i32
      %24 = arith.index_cast %23 : i32 to index
      %c0_13 = arith.constant 0 : index
      %c0_14 = arith.constant 0 : index
      %25 = vector.load %arg12[%24, %c0_13, %c0_14] : memref<2x4x256xf32, #tpu.memory_space<vmem>>, vector<1x4x256xf32>
      %26 = vector.shape_cast %25 : vector<1x4x256xf32> to vector<4x256xf32>
      %27 = vector.shape_cast %21 : vector<4x256xf32> to vector<1x4x256xf32>
      tpu.vector_store %arg12[%24, %c0_13, %c0_14], %27 {strides = array<i32>} : memref<2x4x256xf32, #tpu.memory_space<vmem>>, vector<1x4x256xf32>,
      %c0_15 = arith.constant 0 : index
      %c0_16 = arith.constant 0 : index
      %28 = vector.load %arg4[%c0_15, %c0_16] : memref<8x4xf32, #tpu.memory_space<vmem>>, vector<8x4xf32>
      %cst = arith.constant dense<0.000000e+00> : vector<8x256xf32>
      %29 = tpu.matmul %28, %21, %cst {dimension_numbers = #tpu.dot_dimension_numbers<[1], [0], [0], [1], [0, 0, 1, 1], [], []>} : vector<8x4xf32>, vector<4x256xf32>, vector<8x256xf32> -> vector<8x256xf32>
      %cst_17 = arith.constant 0.000000e+00 : f32
      %30 = vector.broadcast %cst_17 : f32 to vector<8x128xf32>
      %cst_18 = arith.constant 0.000000e+00 : f32
      %31 = vector.broadcast %cst_18 : f32 to vector<8x128xf32>
      %32 = vector.extract_strided_slice %29 {offsets = [0, 0], sizes = [8, 128], strides = [1, 1]} : vector<8x256xf32> to vector<8x128xf32>
      %33 = arith.addf %30, %32 : vector<8x128xf32>
      %34 = arith.mulf %32, %32 : vector<8x128xf32>
      %35 = arith.addf %31, %34 : vector<8x128xf32>
      %36 = vector.extract_strided_slice %29 {offsets = [0, 128], sizes = [8, 128], strides = [1, 1]} : vector<8x256xf32> to vector<8x128xf32>
      %37 = arith.addf %33, %36 : vector<8x128xf32>
      %38 = arith.mulf %36, %36 : vector<8x128xf32>
      %39 = arith.addf %35, %38 : vector<8x128xf32>
      %c0_19 = arith.constant 0 : index
      %c0_20 = arith.constant 0 : index
      %40 = vector.load %arg8[%c0_19, %c0_20] : memref<8x128xf32, #tpu.memory_space<vmem>>, vector<8x128xf32>
      %41 = arith.addf %40, %37 : vector<8x128xf32>
      %c0_21 = arith.constant 0 : index
      %c0_22 = arith.constant 0 : index
      %42 = vector.load %arg8[%c0_21, %c0_22] : memref<8x128xf32, #tpu.memory_space<vmem>>, vector<8x128xf32>
      tpu.vector_store %arg8[%c0_21, %c0_22], %41 {strides = array<i32>} : memref<8x128xf32, #tpu.memory_space<vmem>>, vector<8x128xf32>,
      %c0_23 = arith.constant 0 : index
      %c0_24 = arith.constant 0 : index
      %43 = vector.load %arg9[%c0_23, %c0_24] : memref<8x128xf32, #tpu.memory_space<vmem>>, vector<8x128xf32>
      %44 = arith.addf %43, %39 : vector<8x128xf32>
      %c0_25 = arith.constant 0 : index
      %c0_26 = arith.constant 0 : index
      %45 = vector.load %arg9[%c0_25, %c0_26] : memref<8x128xf32, #tpu.memory_space<vmem>>, vector<8x128xf32>
      tpu.vector_store %arg9[%c0_25, %c0_26], %44 {strides = array<i32>} : memref<8x128xf32, #tpu.memory_space<vmem>>, vector<8x128xf32>,
    } else {
    }
    %c1_i32 = arith.constant 1 : i32
    %10 = arith.cmpi eq, %arg0, %c1_i32 : i32
    %c0_i32_5 = arith.constant 0 : i32
    %11 = arith.cmpi eq, %arg1, %c0_i32_5 : i32
    %12 = arith.andi %10, %11 : i1
    %c0_i32_6 = arith.constant 0 : i32
    %13 = arith.cmpi eq, %arg2, %c0_i32_6 : i32
    %14 = arith.andi %12, %13 : i1
    %15 = arith.extui %14 : i1 to i32
    %c0_i32_7 = arith.constant 0 : i32
    %16 = arith.cmpi ne, %15, %c0_i32_7 : i32
    scf.if %16 {
      %c0 = arith.constant 0 : index
      %c0_10 = arith.constant 0 : index
      %20 = vector.load %arg8[%c0, %c0_10] : memref<8x128xf32, #tpu.memory_space<vmem>>, vector<8x128xf32>
      %cst = arith.constant dense<0.000000e+00> : vector<8xf32>
      %21 = vector.multi_reduction <add>, %20, %cst [1] : vector<8x128xf32> to vector<8xf32>
      %22 = vector.shape_cast %21 : vector<8xf32> to vector<8x1xf32>
      %c0_11 = arith.constant 0 : index
      %c0_12 = arith.constant 0 : index
      %23 = vector.load %arg9[%c0_11, %c0_12] : memref<8x128xf32, #tpu.memory_space<vmem>>, vector<8x128xf32>
      %cst_13 = arith.constant dense<0.000000e+00> : vector<8xf32>
      %24 = vector.multi_reduction <add>, %23, %cst_13 [1] : vector<8x128xf32> to vector<8xf32>
      %25 = vector.shape_cast %24 : vector<8xf32> to vector<8x1xf32>
      %cst_14 = arith.constant 0.001953125 : f32
      %26 = vector.broadcast %cst_14 : f32 to vector<8x1xf32>
      %27 = arith.mulf %22, %26 : vector<8x1xf32>
      %cst_15 = arith.constant 0.001953125 : f32
      %28 = vector.broadcast %cst_15 : f32 to vector<8x1xf32>
      %29 = arith.mulf %25, %28 : vector<8x1xf32>
      %30 = arith.mulf %27, %27 : vector<8x1xf32>
      %31 = arith.subf %29, %30 : vector<8x1xf32>
      %cst_16 = arith.constant 0.000000e+00 : f32
      %32 = vector.broadcast %cst_16 : f32 to vector<8x1xf32>
      %33 = arith.maximumf %31, %32 : vector<8x1xf32>
      %c0_17 = arith.constant 0 : index
      %c0_18 = arith.constant 0 : index
      %34 = vector.load %arg5[%c0_17, %c0_18] : memref<8x1xf32, #tpu.memory_space<vmem>>, vector<8x1xf32>
      %cst_19 = arith.constant 9.99999974E-6 : f32
      %35 = vector.broadcast %cst_19 : f32 to vector<8x1xf32>
      %36 = arith.addf %33, %35 : vector<8x1xf32>
      %37 = math.rsqrt %36 : vector<8x1xf32>
      %38 = arith.mulf %34, %37 : vector<8x1xf32>
      %c0_20 = arith.constant 0 : index
      %c0_21 = arith.constant 0 : index
      %39 = vector.load %arg6[%c0_20, %c0_21] : memref<8x1xf32, #tpu.memory_space<vmem>>, vector<8x1xf32>
      %40 = arith.mulf %27, %38 : vector<8x1xf32>
      %41 = arith.subf %39, %40 : vector<8x1xf32>
      %c0_22 = arith.constant 0 : index
      %c0_23 = arith.constant 0 : index
      %42 = vector.load %arg11[%c0_22, %c0_23] : memref<8x1xf32, #tpu.memory_space<vmem>>, vector<8x1xf32>
      tpu.vector_store %arg11[%c0_22, %c0_23], %41 {strides = array<i32>} : memref<8x1xf32, #tpu.memory_space<vmem>>, vector<8x1xf32>,
      %c0_24 = arith.constant 0 : index
      %c0_25 = arith.constant 0 : index
      %43 = vector.load %arg4[%c0_24, %c0_25] : memref<8x4xf32, #tpu.memory_space<vmem>>, vector<8x4xf32>
      %44 = vector.broadcast %38 : vector<8x1xf32> to vector<8x4xf32>
      %45 = arith.mulf %43, %44 : vector<8x4xf32>
      %c0_26 = arith.constant 0 : index
      %c0_27 = arith.constant 0 : index
      %46 = vector.load %arg10[%c0_26, %c0_27] : memref<8x4xf32, #tpu.memory_space<vmem>>, vector<8x4xf32>
      tpu.vector_store %arg10[%c0_26, %c0_27], %45 {strides = array<i32>} : memref<8x4xf32, #tpu.memory_space<vmem>>, vector<8x4xf32>,
    } else {
    }
    %c1_i32_8 = arith.constant 1 : i32
    %17 = arith.cmpi eq, %arg0, %c1_i32_8 : i32
    %18 = arith.extui %17 : i1 to i32
    %c0_i32_9 = arith.constant 0 : i32
    %19 = arith.cmpi ne, %18, %c0_i32_9 : i32
    scf.if %19 {
      %c1_i32_10 = arith.constant 1 : i32
      %20 = arith.muli %arg1, %c1_i32_10 : i32
      %21 = arith.addi %20, %arg2 : i32
      %22 = arith.index_cast %21 : i32 to index
      %c0 = arith.constant 0 : index
      %c0_11 = arith.constant 0 : index
      %23 = vector.load %arg12[%22, %c0, %c0_11] : memref<2x4x256xf32, #tpu.memory_space<vmem>>, vector<1x4x256xf32>
      %24 = vector.shape_cast %23 : vector<1x4x256xf32> to vector<4x256xf32>
      %c0_12 = arith.constant 0 : index
      %c0_13 = arith.constant 0 : index
      %25 = vector.load %arg10[%c0_12, %c0_13] : memref<8x4xf32, #tpu.memory_space<vmem>>, vector<8x4xf32>
      %cst = arith.constant dense<0.000000e+00> : vector<8x256xf32>
      %26 = tpu.matmul %25, %24, %cst {dimension_numbers = #tpu.dot_dimension_numbers<[1], [0], [0], [1], [0, 0, 1, 1], [], []>} : vector<8x4xf32>, vector<4x256xf32>, vector<8x256xf32> -> vector<8x256xf32>
      %c0_14 = arith.constant 0 : index
      %c0_15 = arith.constant 0 : index
      %27 = vector.load %arg11[%c0_14, %c0_15] : memref<8x1xf32, #tpu.memory_space<vmem>>, vector<8x1xf32>
      %28 = vector.broadcast %27 : vector<8x1xf32> to vector<8x256xf32>
      %29 = arith.addf %26, %28 : vector<8x256xf32>
      %cst_16 = arith.constant 0.000000e+00 : f32
      %30 = vector.broadcast %cst_16 : f32 to vector<8x256xf32>
      %31 = arith.maximumf %29, %30 : vector<8x256xf32>
      %c0_17 = arith.constant 0 : index
      %c0_18 = arith.constant 0 : index
      %c0_19 = arith.constant 0 : index
      %32 = vector.load %arg7[%c0_17, %c0_18, %c0_19] : memref<1x8x256xf32, #tpu.memory_space<vmem>>, vector<1x8x256xf32>
      %33 = vector.shape_cast %32 : vector<1x8x256xf32> to vector<8x256xf32>
      %34 = vector.shape_cast %31 : vector<8x256xf32> to vector<1x8x256xf32>
      tpu.vector_store %arg7[%c0_17, %c0_18, %c0_19], %34 {strides = array<i32>} : memref<1x8x256xf32, #tpu.memory_space<vmem>>, vector<1x8x256xf32>,
    } else {
    }
    return
  }
  func.func @transform_0(%arg0: i32, %arg1: i32, %arg2: i32) -> (i32, i32, i32) {
    %c1_i32 = arith.constant 1 : i32
    %0 = arith.subi %c1_i32, %arg0 : i32
    %1 = arith.muli %arg1, %0 : i32
    %c1_i32_0 = arith.constant 1 : i32
    %2 = arith.subi %c1_i32_0, %arg0 : i32
    %3 = arith.muli %arg2, %2 : i32
    %c0_i32 = arith.constant 0 : i32
    %c0_i32_1 = arith.constant 0 : i32
    return %1, %c0_i32, %3 : i32, i32, i32
  }
  func.func @transform_1(%arg0: i32, %arg1: i32, %arg2: i32) -> (i32, i32) {
    %c0_i32 = arith.constant 0 : i32
    %c0_i32_0 = arith.constant 0 : i32
    %c0_i32_1 = arith.constant 0 : i32
    return %c0_i32, %c0_i32_0 : i32, i32
  }
  func.func @transform_2(%arg0: i32, %arg1: i32, %arg2: i32) -> (i32, i32) {
    %c0_i32 = arith.constant 0 : i32
    %c0_i32_0 = arith.constant 0 : i32
    %c0_i32_1 = arith.constant 0 : i32
    return %c0_i32, %c0_i32_0 : i32, i32
  }
  func.func @transform_3(%arg0: i32, %arg1: i32, %arg2: i32) -> (i32, i32) {
    %c0_i32 = arith.constant 0 : i32
    %c0_i32_0 = arith.constant 0 : i32
    %c0_i32_1 = arith.constant 0 : i32
    return %c0_i32, %c0_i32_0 : i32, i32
  }
  func.func @transform_4(%arg0: i32, %arg1: i32, %arg2: i32) -> (i32, i32, i32) {
    %0 = arith.muli %arg1, %arg0 : i32
    %1 = arith.muli %arg2, %arg0 : i32
    %c0_i32 = arith.constant 0 : i32
    %c0_i32_0 = arith.constant 0 : i32
    return %0, %c0_i32, %1 : i32, i32, i32
  }
}

</mosaic_0001>

<bundles_post_ra>
// kernel: tpu_custom_call.1
= control target key start
LH: loop header
LB: loop body
LE: loop exit
PB: predicated region body
PF: predicated region fallthrough
CT: control target
= control target key end

     0   :  { %9 = vsyncpa [#allocation8], 0  ;;  %s1021_s0 = inlined_call_operand.vmem [shape: f32[2,4,256], index: 0, kind: input, shape index: {}]   ;;  %s1022_s1 = inlined_call_operand.vmem [shape: f32[8,4], index: 1, kind: input, shape index: {}]   ;;  %s1023_s2 = inlined_call_operand.vmem [shape: f32[8,1], index: 2, kind: input, shape index: {}]   ;;  %s1024_s3 = inlined_call_operand.vmem [shape: f32[8,1], index: 3, kind: input, shape index: {}]   ;;  %s1025_s4 = inlined_call_operand.hbm [shape: f32[2,8,256], index: 4, kind: output, shape index: {}]  }
   0x1   :  { %11 = vsyncpa [#allocation8 + $0x1], 0  ;;  %s861_s15 = smov 0   ;;  %s863_s16 = smov 0  }
   0x2   :  { %s865_s17 = smov 0   ;;  %s867_s18 = smov 0  }
   0x3   :  { %s869_s19 = smov 0   ;;  %s871_s20 = smov 0  }
   0x4   :  { %s873_s21 = smov 0   ;;  %s875_s22 = smov 0  }
   0x5 LB: > { %s620_s23 = sadd.s32 4294967295, %s828_s22   ;;  %s621_s24 = sadd.s32 4294967294, %s828_s22   ;;  %s828_s22 = sphi %s875_s22, %s17_s22   ;;  %s824_s21 = sphi %s873_s21, %s1034_s21   ;;  %s820_s20 = sphi %s871_s20, %s1033_s20   ;;  %s816_s19 = sphi %s869_s19, %s1032_s19   ;;  %s812_s18 = sphi %s867_s18, %s1031_s18   ;;  %s808_s17 = sphi %s865_s17, %s1030_s17   ;;  %s804_s16 = sphi %s863_s16, %s1029_s16   ;;  %s800_s15 = sphi %s861_s15, %s1028_s15  }
   0x6   : > { %s32_s25 = sadd.s32 1, %s820_s20  ;;  %s36_s26 = sadd.s32 1, %s824_s21 }
   0x7   : > { %p34_p0 = scmp.ge.s32.totalorder %s32_s25, 2  ;;  %s137_s27 = smul.u32 %s820_s20, %s824_s21 }
   0x8   : > { %p156_p1 = scmp.ne.s32.totalorder %s808_s17, %s804_s16  ;;  %p157_p2 = scmp.eq.s32.totalorder %s620_s23, 3 }
   0x9   : > { %s1036_s25 = smov (%p34_p0, %s32_s25), 0  ;;  %s1038_s26 = smov (!%p34_p0, %s36_s26), %s824_s21 }
   0xa   : > { %p162_p3 = scmp.ne.s32.totalorder %s804_s16, %s800_s15  ;;  %p38_p4 = scmp.ge.s32.totalorder %s1038_s26, 2 }
   0xb   : > { %p163_p5 = scmp.eq.s32.totalorder %s621_s24, 3  ;;  %p914_p6 = por %p157_p2, %p156_p1 }
   0xc   : > { %p624_p7 = scmp.ge.s32.totalorder %s828_s22, 1  ;;  %s1040_s26 = smov (%p38_p4, %s1038_s26), 0 }
   0xd   : > { %p921_p8 = por %p163_p5, %p162_p3  ;;  %p209_p9 = scmp.lt.s32.totalorder %s828_s22, 5 }
   0xe   : > { %s139_s30 = smul.u32 %s1040_s26, %s1036_s25  ;;  %s146_s6 = sadd.s32 1, %s808_s17 }
   0xf   : > { %p210_p10 = pnand %p624_p7, %p209_p9 }
  0x10   : > { %s141_s5 = ssub.s32 %s137_s27, %s139_s30  ;;  %s239_s8 = sand.u32 (!%p210_p10), 1, %s804_s16  }
  0x11   : > { %p144_p11 = scmp.eq.s32.totalorder %s141_s5, 0  ;;  %213 = sbr.rel (%p210_p10) target bundleno = 812 (0x32c), region = 36 }
  0x12   : > { %s242_s9 = ssub.s32 (!%p210_p10), 1, %s816_s19  ;;  %s625_s10 = sshll.u32 (!%p210_p10), %s239_s8, 4 }
  0x13   : > { %s930_s7 = scalar_select %p144_p11, %s808_s17, %s146_s6  }
  0x14   : > { %s243_s11 = smul.u32 (!%p210_p10), %s812_s18, %s242_s9  ;;  %p261_p12 = scmp.eq.s32.totalorder (!%p210_p10), %s816_s19, 0 }
  0x15   : > { %p262_p0 = scmp.eq.s32.totalorder (!%p210_p10), %s812_s18, 0  ;;  %s944_s24 = scalar_lea.vmem (!%p210_p10), [#allocation7], %s625_s10 }
  0x16   : > { %p246_p13 = scmp.lt.s32.totalorder (!%p210_p10), %s243_s11, 1 }
  0x17   : > { %p263_p1 = pnand (!%p210_p10), %p262_p0, %p261_p12 }
  0x18   : > { %s1042_s11 = smov (!%p246_p13, %s243_s11), 1  ;;  %v830_v0 = vmov (!%p263_p1), 0.0  }
  0x19   : > { %s647_s12 = sshll.u32 %s1042_s11, 3  ;;  %269 = sbr.rel (%p263_p1) target bundleno = 32 (0x20), region = 40  ;;  %270 = vst [vmem:[#allocation2] sm:$0xff] (!%p263_p1), %v830_v0  ;;  %271 = vst [vmem:[#allocation3] sm:$0xff] (!%p263_p1), %v830_v0 }
  0x1a   : > { %s253_s23 = scalar_lea.vmem %s1021_s0, %s647_s12 }
  0x20 PF: > { %p629_p2 = scmp.ne.s32.totalorder %s816_s19, 0 }
  0x21   : > { %v275_v1 = vld [vmem:[%s253_s23] sm:$0xff] (!%p629_p2)  ;;  %s648_s27 = sshll.u32 (!%p629_p2), %s812_s18, 3  ;;  %vm288_vm0 = vcmask (!%p629_p2), 1043456   ;;  %v831_v3 = vmov (!%p629_p2), 0.0   ;;  %vm284_vm1 = vcmask (!%p629_p2), 31744   ;;  %v373_v11 = vld [vmem:[#allocation3] sm:$0xff] (!%p629_p2) }
  0x22   : > { %274 = sbr.rel (%p629_p2) target bundleno = 258 (0x102), region = 44  ;;  %v283_v2 = vcombine.high (!%p629_p2), %v275_v1, %v275_v1  ;;  %357 = vmatprep.mubr.f32.mxu0 (!%p629_p2), %v831_v3  ;;  %s279_s30 = scalar_lea.vmem (!%p629_p2), [#allocation6], %s648_s27  ;;  %v281_v4 = vld [vmem:[%s1022_s1] sm:$0xff] (!%p629_p2) }
  0x23   : > { %280 = vst [vmem:[%s279_s30] sm:$0xff] (!%p629_p2), %v275_v1  ;;  %v370_v8 = vld [vmem:[#allocation2] sm:$0xff] (!%p629_p2) }
  0x24   : > { %632 = vmatprep.subr.msk.mxu0 (!%p629_p2), %vm288_vm0, %v283_v2 }
  0x25   : > { %633 = vmatpush1.msk.msra.mxu0 (!%p629_p2), %vm288_vm0, %v275_v1 }
  0x26   : > { %634 = vmatmul.mubr.msk.f32.vlgmr.msra.gmra.mrb[0].mxu0 (!%p629_p2), %vm284_vm1, %v281_v4 }
  0xf9   : > { %v359_v5 = vpop.f32.mrb[0].mxu0 }
  0xfa   : > { %v365_v6 = vmul.f32 %v359_v5, %v359_v5  ;;  %v361_v7 = vpop.f32.mrb[1].mxu0 }
  0xfb   : > { %v367_v9 = vadd.f32 %v361_v7, %v359_v5  ;;  %v368_v10 = vmul.f32 %v361_v7, %v361_v7 }
  0xfd   : > { %v369_v12 = vadd.f32 %v368_v10, %v365_v6  ;;  %v371_v13 = vadd.f32 %v370_v8, %v367_v9 }
  0xff   : > { %372 = vst [vmem:[#allocation2] sm:$0xff] %v371_v13  ;;  %v374_v14 = vadd.f32 %v373_v11, %v369_v12 }
 0x101   : > { %375 = vst [vmem:[#allocation3] sm:$0xff] %v374_v14 }
 0x102 PF: > { %p376_p3 = scmp.eq.s32.totalorder %s816_s19, 1 }
 0x104   : > { %p377_p4 = pnand %p376_p3, %p262_p0 }
 0x105   : > { %v832_v17 = vmov (!%p377_p4), 0   ;;  %v394_v26 = vld [vmem:[%s1023_s2] sm:$0xff] (!%p377_p4)  ;;  %vm401_vm2 = vcmask (!%p377_p4), 7168   ;;  %vm410_vm3 = vcmask (!%p377_p4), 31744  }
 0x106   : > { %382 = sbr.rel (%p377_p4) target bundleno = 561 (0x231), region = 48  ;;  %v383_v15 = vld [vmem:[#allocation2] sm:$0xff] (!%p377_p4)  ;;  %728 = vset.pattern.permute.xlu1 (!%p377_p4), %v832_v17  ;;  %729 = vset.pattern.permute.xlu0 (!%p377_p4), %v832_v17 }
 0x107   : > { %384 = vadd.xlane.f32.xlu0 (!%p377_p4), %v383_v15  ;;  %v398_v29 = vld [vmem:[%s1024_s3] sm:$0xff] (!%p377_p4) }
 0x108   : > { %v386_v16 = vld [vmem:[#allocation3] sm:$0xff] (!%p377_p4)  ;;  %v403_v32 = vld [vmem:[%s1022_s1] sm:$0xff] (!%p377_p4) }
 0x10b   : > { %387 = vadd.xlane.f32.xlu0 (!%p377_p4), %v386_v16 }
 0x194   : > { %v385_v18 = vpop.xlane.xlu0 %384 }
 0x195   : > { %v389_v19 = vmul.f32 0.001953125, %v385_v18 }
 0x197   : > { %v391_v21 = vmul.f32 %v389_v19, %v389_v19 }
 0x198   : > { %v388_v20 = vpop.xlane.xlu0 %387 }
 0x199   : > { %v390_v22 = vmul.f32 0.001953125, %v388_v20 }
 0x19b   : > { %v392_v23 = vsub.f32 %v390_v22, %v391_v21 }
 0x19d   : > { %v393_v24 = vmax.f32 %v392_v23, 0.0 }
 0x19f   : > { %v395_v25 = vadd.f32 1e-05, %v393_v24 }
 0x1a1   : > { %730 = vrsqrt.f32 %v395_v25 }
 0x1ab   : > { %v731_v27 = vpop.eup %730 }
 0x1ac   : > { %v397_v28 = vmul.f32 %v731_v27, %v394_v26 }
 0x1ae   : > { %406 = vperm.xlu1 %728, %v397_v28   ;;  %v399_v30 = vmul.f32 %v397_v28, %v389_v19 }
 0x1b0   : > { %v400_v31 = vsub.f32 %v398_v29, %v399_v30 }
 0x1b2   : > { %402 = vst.msk [vmem:[#allocation5] sm:$0xff] %vm401_vm2, %v400_v31 }
 0x22d   : > { %v407_v33 = vpop.permute.xlu1 %406 }
 0x22e   : > { %v409_v34 = vmul.f32 %v407_v33, %v403_v32 }
 0x230   : > { %411 = vst.msk [vmem:[#allocation4] sm:$0xff] %vm410_vm3, %v409_v34 }
 0x231 PF: > { %p636_p5 = scmp.ne.s32.totalorder %s816_s19, 1 }
 0x232   : > { %s649_s23 = sshll.u32 (!%p636_p5), %s812_s18, 3  ;;  %v833_v35 = vmov (!%p636_p5), 0.0   ;;  %v834_v36 = vmov (!%p636_p5), 0   ;;  %v421_v37 = vld [vmem:[#allocation5] sm:$0xff] (!%p636_p5)  ;;  %vm433_vm4 = vcmask (!%p636_p5), 1043456   ;;  %vm429_vm5 = vcmask (!%p636_p5), 31744  }
 0x233   : > { %414 = sbr.rel (%p636_p5) target bundleno = 787 (0x313), region = 52  ;;  %502 = vmatprep.mubr.f32.mxu0 (!%p636_p5), %v833_v35  ;;  %732 = vset.pattern.permute.xlu0 (!%p636_p5), %v834_v36  ;;  %s418_s27 = scalar_lea.vmem (!%p636_p5), [#allocation6], %s649_s23 }
 0x234   : > { %v419_v38 = vld [vmem:[%s418_s27] sm:$0xff] (!%p636_p5)  ;;  %424 = vperm.xlu0 (!%p636_p5), %732, %v421_v37  }
 0x235   : > { %v428_v39 = vcombine.high (!%p636_p5), %v419_v38, %v419_v38 }
 0x237   : > { %v420_v40 = vld [vmem:[#allocation4] sm:$0xff] (!%p636_p5)  ;;  %639 = vmatprep.subr.msk.mxu0 (!%p636_p5), %vm433_vm4, %v428_v39 }
 0x238   : > { %640 = vmatpush1.msk.msra.mxu0 (!%p636_p5), %vm433_vm4, %v419_v38 }
 0x239   : > { %641 = vmatmul.mubr.msk.f32.vlgmr.msra.gmra.mrb[0].mxu0 (!%p636_p5), %vm429_vm5, %v420_v40 }
 0x2b3   : > { %v425_v41 = vpop.permute.xlu0 %424 }
 0x30c   : > { %v504_v42 = vpop.f32.mrb[0].mxu0 }
 0x30d   : > { %v505_v43 = vadd.f32 %v504_v42, %v425_v41  ;;  %v506_v44 = vpop.f32.mrb[1].mxu0 }
 0x30e   : > { %v507_v45 = vadd.f32 %v506_v44, %v425_v41 }
 0x30f   : > { %v509_v46 = vmax.f32 %v505_v43, 0.0 }
 0x310   : > { %v510_v47 = vmax.f32 %v507_v45, 0.0 }
 0x311   : > { %511 = vst [vmem:[%s944_s24] sm:$0xff] %v509_v46 }
 0x312   : > { %512 = vst [vmem:[%s944_s24 + $0x8] sm:$0xff] %v510_v47 }
 0x313 PF: > { %s521_s30 = smul.u32 %s812_s18, %s816_s19  ;;  %s532_s5 = sshll.u32 %s944_s24, 4  ;;  %s970_s5 = int_to_ptr.vmem [resolvable:$true] %s532_s5 }
 0x314   : > { %s514_s12 = scalar_lea.sflag [#allocation8], %s239_s8  ;;  %s734_s13 = scalar_lea.vmem %s970_s5, 256 }
 0x315   : > { %s650_s6 = sshll.u32 %s521_s30, 8  ;;  %p735_p7 = scmp.ne.s32.totalorder %s970_s5, %s734_s13 }
 0x316   : > { %s530_s11 = scalar_lea.hbm %s1025_s4, %s650_s6  ;;  %s835_s14 = smov [#allocation7]  }
 0x317   : > { %p736_p9 = pnand %p735_p7, %p914_p6  ;;  %s738_s18 = sshll.u32 %s835_s14, 4  ;;  %s739_s18 = int_to_ptr.vmem [resolvable:$false] %s738_s18 }
 0x318   : > { %s740_s19 = scalar_lea.vmem %s739_s18, 512  ;;  %p741_p11 = scmp.lt.s32.totalorder %s970_s5, %s739_s18 }
 0x319   : > { %p737_p10 = pneg %p736_p9  ;;  %p742_p12 = scmp.lt.s32.totalorder %s740_s19, %s734_s13 }
 0x31b   : > { %p743_p13 = por %p742_p12, %p741_p11 }
 0x31d   : > { %p744_p0 = pnand %p743_p13, %p737_p10 }
 0x31f   : > { %747 = shalt.err (!%p744_p0)
}
 0x320   : > { %s748_s24 = scalar_lea.hbm %s530_s11, 256  ;;  %s752_s27 = scalar_lea.hbm %s1025_s4, 512 }
 0x321   : > { %p749_p1 = scmp.ne.s32.totalorder %s530_s11, %s748_s24  ;;  %p753_p4 = scmp.lt.u32.totalorder %s530_s11, %s1025_s4 }
 0x322   : > { %p754_p5 = scmp.lt.u32.totalorder %s752_s27, %s748_s24  ;;  %p756_p9 = scmp.lt.u32.totalorder %s748_s24, %s530_s11 }
 0x323   : > { %p750_p2 = pnand %p749_p1, %p914_p6 }
 0x324   : > { %p755_p7 = por %p754_p5, %p753_p4 }
 0x325   : > { %p751_p3 = pneg %p750_p2 }
 0x326   : > { %p757_p11 = por %p756_p9, %p755_p7 }
 0x328   : > { %p758_p10 = pnand %p757_p11, %p751_p3 }
 0x32a   : > { %761 = shalt.err (!%p758_p10)
}
 0x32b   : > { %651 = dma.vmem_to_hbm [thread:$0]  (%p914_p6), %s970_s5, 256, %s530_s11, %s514_s12  }
 0x32c PF: > { %p657_p12 = scmp.ge.s32.totalorder %s828_s22, 2  ;;  %s544_s9 = sand.u32 1, %s800_s15  }
 0x32d   : > { %s545_s10 = scalar_lea.sflag [#allocation8], %s544_s9 }
 0x32e   : > { %p654_p13 = pnand %p657_p12, %p921_p8 }
 0x330   : > { %795 = dma.done.wait (!%p654_p13), %s545_s10, 256  }
 0x331   : > { %797 = vsyncadd (!%p654_p13), %s545_s10, 4294967040  ;;  %s17_s22 = sadd.s32 1, %s828_s22   ;;  %s1028_s15 = smov %s804_s16 }
 0x332   : > { %p14_p0 = scmp.ge.s32.totalorder %s17_s22, 6   ;;  %s1029_s16 = smov %s808_s17 }
 0x333   : > { %s1030_s17 = smov %s930_s7  ;;  %s1031_s18 = smov %s820_s20 }
 0x334   : > { %s1032_s19 = smov %s824_s21  ;;  %s1033_s20 = smov %s1036_s25 }
 0x335   : > { %s1034_s21 = smov %s1040_s26  ;;  %16 = sbr.rel (!%p14_p0) target bundleno = 5 (0x5), region = 89 }
 0x33c   :  { %550 = vsyncpa [#allocation8], 1 }
 0x33d   :  { %552 = vsyncpa [#allocation8 + $0x1], 1 }

</bundles_post_ra>
